<compile_context>
chip_gen: v7x
topology: tpu7x:2x2x1
jax: 0.10.0
libtpu: 0.0.40
codegen_flags: <defaults>
</compile_context>

<pallas_src>
import functools

import jax
import jax.numpy as jnp
from jax.experimental import pallas as pl
from jax.experimental.pallas import tpu as pltpu


def linear_softmax2_kernel(wd_ref, x_ref, o_ref):
    """Linear(F, 2) + softmax(2), specialized via the logit difference.

    wd_ref: SMEM (F+1,) float32 = [w[1]-w[0] (F scalars), b[1]-b[0]]
    x_ref : VMEM (F, S, 128) float32  -- batch dense on (sublane, lane)
    o_ref : VMEM (2, S, 128) float32
    """
    f_dim = x_ref.shape[0]

    # d = logit1 - logit0, pure VPU FMAs on full (S, 128) slabs.
    d = wd_ref[0] * x_ref[0]
    for fi in range(1, f_dim):
        d = d + wd_ref[fi] * x_ref[fi]
    d = d + wd_ref[f_dim]

    # softmax over 2 classes: p1 = sigmoid(d), p0 = sigmoid(-d).
    # Two EUP exps + divides; stable on both tails, no 1-p cancellation.
    p1 = 1.0 / (1.0 + jnp.exp(-d))
    p0 = 1.0 / (1.0 + jnp.exp(d))

    # Direct row stores -- no sublane concatenation / relayout.
    o_ref[0] = p0.astype(o_ref.dtype)
    o_ref[1] = p1.astype(o_ref.dtype)


@functools.partial(jax.jit, static_argnames=("max_block_rows",))
def linear_classifier_forward(x, w, b, *, max_block_rows=2048):
    """x: (N, F) float32, w: (C, F) PyTorch layout, b: (C,). Returns (N, C) probs.

    max_block_rows: max sublane rows S per block (S*128 samples per grid step).
      Default 2048 -> ~10 MiB double-buffered, safe on v5e/v6e/v7x default
      scoped VMEM. On v7x, S~4096 + vmem_limit_bytes~48 MiB gets closer to the
      3.2 TB/s roofline.
    """
    n, f = x.shape
    c = w.shape[0]
    assert c == 2, "kernel is specialized for 2 output classes (Linear(3, 2))"

    # Batch layout: (F, M, 128) with M sublane rows of 128 lanes each.
    m = -(-n // 128)
    num_blocks = max(1, -(-m // max_block_rows))
    s = -(-m // num_blocks)            # rows per block
    s = -(-s // 8) * 8                 # sublane-align (8)
    m_pad = num_blocks * s             # pad waste <= num_blocks*8 rows
    n_pad = m_pad * 128

    # Precompute the logit-difference weights: F+1 scalars in SMEM.
    wd = jnp.concatenate(
        [(w[1] - w[0]).astype(jnp.float32),
         (b[1] - b[0]).reshape(1).astype(jnp.float32)])

    # Single fused pad pass (no zeros + dynamic_update_slice), free reshape.
    x_t = jnp.pad(x.T.astype(jnp.float32), ((0, 0), (0, n_pad - n)))
    x_t = x_t.reshape(f, m_pad, 128)

    out = pl.pallas_call(
        linear_softmax2_kernel,
        out_shape=jax.ShapeDtypeStruct((c, m_pad, 128), jnp.float32),
        grid=(num_blocks,),
        in_specs=[
            pl.BlockSpec(memory_space=pltpu.MemorySpace.SMEM),     # F+1 scalars
            pl.BlockSpec((f, s, 128), lambda i: (0, i, 0)),        # x block
        ],
        out_specs=pl.BlockSpec((c, s, 128), lambda i: (0, i, 0)),  # prob block
        compiler_params=pltpu.CompilerParams(
            dimension_semantics=("parallel",),   # batch axis: megacore-splittable
        ),
    )(wd, x_t)

    # Back to PyTorch's (N, C); fuses with consumers under jit.
    return out.reshape(c, n_pad)[:, :n].T


if __name__ == "__main__":
    # RGB inputs from the original spec (10 samples, 3 features).
    x = jnp.array(
        [[0.69, 0.13, 0.13], [0.91, 0.58, 0.47], [0.18, 0.30, 0.30],
         [0.67, 0.84, 0.90], [0.58, 0.00, 0.82], [0.86, 0.62, 0.86],
         [0.09, 0.09, 0.43], [0.96, 0.96, 0.86], [0.18, 0.54, 0.34],
         [1.00, 0.38, 0.27]], dtype=jnp.float32)

    F, C = 3, 2
    key = jax.random.PRNGKey(0)
    kw, kb = jax.random.split(key, 2)
    bound = 1.0 / jnp.sqrt(jnp.float32(F))
    w = jax.random.uniform(kw, (C, F), jnp.float32, -bound, bound)   # PyTorch (out, in)
    b = jax.random.uniform(kb, (C,), jnp.float32, -bound, bound)

    out = jax.block_until_ready(linear_classifier_forward(x, w, b))
    ref = jax.nn.softmax(x @ w.T + b, axis=-1)
    assert jnp.allclose(out, ref, atol=1e-5, rtol=1e-5), "mismatch vs reference (N=10)"

    # Non-multiple-of-128 batch, still single block.
    x_mid = jax.random.uniform(jax.random.PRNGKey(1), (700, F), jnp.float32)
    out_mid = jax.block_until_ready(linear_classifier_forward(x_mid, w, b))
    ref_mid = jax.nn.softmax(x_mid @ w.T + b, axis=-1)
    assert jnp.allclose(out_mid, ref_mid, atol=1e-5, rtol=1e-5), "mismatch vs reference (N=700)"

    # Larger batch with a small block cap to exercise the multi-block 'parallel' grid.
    x_big = jax.random.uniform(jax.random.PRNGKey(2), (70000, F), jnp.float32)
    out_big = jax.block_until_ready(
        linear_classifier_forward(x_big, w, b, max_block_rows=64))
    ref_big = jax.nn.softmax(x_big @ w.T + b, axis=-1)
    assert jnp.allclose(out_big, ref_big, atol=1e-5, rtol=1e-5), "mismatch vs reference (N=70000)"

    print("KERNEL_OK")
</pallas_src>

<mosaic_0001>
module attributes {stable_mosaic.version = 11 : i64} {
  func.func @linear_softmax2_kernel(%arg0: i32, %arg1: memref<4xf32, #tpu.memory_space<smem>>, %arg2: memref<3x8x128xf32, #tpu.memory_space<vmem>>, %arg3: memref<2x8x128xf32, #tpu.memory_space<vmem>>) attributes {dimension_semantics = [#tpu.dimension_semantics<parallel>], iteration_bounds = array<i64: 1>, scalar_prefetch = 0 : i64, scratch_operands = 0 : i64, tpu.core_type = #tpu.core_type<tc>, window_params = [{transform_indices = @transform_0, window_bounds = array<i64: 4>}, {transform_indices = @transform_1, window_bounds = array<i64: 3, 8, 128>}, {transform_indices = @transform_2, window_bounds = array<i64: 2, 8, 128>}]} {
    %c0 = arith.constant 0 : index
    %0 = memref.load %arg1[%c0] : memref<4xf32, #tpu.memory_space<smem>>
    %c0_0 = arith.constant 0 : index
    %c0_1 = arith.constant 0 : index
    %c0_2 = arith.constant 0 : index
    %1 = vector.load %arg2[%c0_0, %c0_1, %c0_2] : memref<3x8x128xf32, #tpu.memory_space<vmem>>, vector<1x8x128xf32>
    %2 = vector.shape_cast %1 : vector<1x8x128xf32> to vector<8x128xf32>
    %3 = vector.broadcast %0 : f32 to vector<8x128xf32>
    %4 = arith.mulf %3, %2 : vector<8x128xf32>
    %c1 = arith.constant 1 : index
    %5 = memref.load %arg1[%c1] : memref<4xf32, #tpu.memory_space<smem>>
    %c1_3 = arith.constant 1 : index
    %c0_4 = arith.constant 0 : index
    %c0_5 = arith.constant 0 : index
    %6 = vector.load %arg2[%c1_3, %c0_4, %c0_5] : memref<3x8x128xf32, #tpu.memory_space<vmem>>, vector<1x8x128xf32>
    %7 = vector.shape_cast %6 : vector<1x8x128xf32> to vector<8x128xf32>
    %8 = vector.broadcast %5 : f32 to vector<8x128xf32>
    %9 = arith.mulf %8, %7 : vector<8x128xf32>
    %10 = arith.addf %4, %9 : vector<8x128xf32>
    %c2 = arith.constant 2 : index
    %11 = memref.load %arg1[%c2] : memref<4xf32, #tpu.memory_space<smem>>
    %c2_6 = arith.constant 2 : index
    %c0_7 = arith.constant 0 : index
    %c0_8 = arith.constant 0 : index
    %12 = vector.load %arg2[%c2_6, %c0_7, %c0_8] : memref<3x8x128xf32, #tpu.memory_space<vmem>>, vector<1x8x128xf32>
    %13 = vector.shape_cast %12 : vector<1x8x128xf32> to vector<8x128xf32>
    %14 = vector.broadcast %11 : f32 to vector<8x128xf32>
    %15 = arith.mulf %14, %13 : vector<8x128xf32>
    %16 = arith.addf %10, %15 : vector<8x128xf32>
    %c3 = arith.constant 3 : index
    %17 = memref.load %arg1[%c3] : memref<4xf32, #tpu.memory_space<smem>>
    %18 = vector.broadcast %17 : f32 to vector<8x128xf32>
    %19 = arith.addf %16, %18 : vector<8x128xf32>
    %cst = arith.constant 0.000000e+00 : f32
    %20 = vector.broadcast %cst : f32 to vector<8x128xf32>
    %21 = arith.subf %20, %19 : vector<8x128xf32>
    %22 = math.exp %21 : vector<8x128xf32>
    %cst_9 = arith.constant 1.000000e+00 : f32
    %23 = vector.broadcast %cst_9 : f32 to vector<8x128xf32>
    %24 = arith.addf %23, %22 : vector<8x128xf32>
    %cst_10 = arith.constant 1.000000e+00 : f32
    %25 = vector.broadcast %cst_10 : f32 to vector<8x128xf32>
    %26 = arith.divf %25, %24 : vector<8x128xf32>
    %27 = math.exp %19 : vector<8x128xf32>
    %cst_11 = arith.constant 1.000000e+00 : f32
    %28 = vector.broadcast %cst_11 : f32 to vector<8x128xf32>
    %29 = arith.addf %28, %27 : vector<8x128xf32>
    %cst_12 = arith.constant 1.000000e+00 : f32
    %30 = vector.broadcast %cst_12 : f32 to vector<8x128xf32>
    %31 = arith.divf %30, %29 : vector<8x128xf32>
    %c0_13 = arith.constant 0 : index
    %c0_14 = arith.constant 0 : index
    %c0_15 = arith.constant 0 : index
    %32 = vector.load %arg3[%c0_13, %c0_14, %c0_15] : memref<2x8x128xf32, #tpu.memory_space<vmem>>, vector<1x8x128xf32>
    %33 = vector.shape_cast %32 : vector<1x8x128xf32> to vector<8x128xf32>
    %34 = vector.shape_cast %31 : vector<8x128xf32> to vector<1x8x128xf32>
    tpu.vector_store %arg3[%c0_13, %c0_14, %c0_15], %34 {strides = array<i32>} : memref<2x8x128xf32, #tpu.memory_space<vmem>>, vector<1x8x128xf32>,
    %c1_16 = arith.constant 1 : index
    %c0_17 = arith.constant 0 : index
    %c0_18 = arith.constant 0 : index
    %35 = vector.load %arg3[%c1_16, %c0_17, %c0_18] : memref<2x8x128xf32, #tpu.memory_space<vmem>>, vector<1x8x128xf32>
    %36 = vector.shape_cast %35 : vector<1x8x128xf32> to vector<8x128xf32>
    %37 = vector.shape_cast %26 : vector<8x128xf32> to vector<1x8x128xf32>
    tpu.vector_store %arg3[%c1_16, %c0_17, %c0_18], %37 {strides = array<i32>} : memref<2x8x128xf32, #tpu.memory_space<vmem>>, vector<1x8x128xf32>,
    return
  }
  func.func @transform_0(%arg0: i32) -> i32 {
    %c0_i32 = arith.constant 0 : i32
    %c0_i32_0 = arith.constant 0 : i32
    return %c0_i32 : i32
  }
  func.func @transform_1(%arg0: i32) -> (i32, i32, i32) {
    %c0_i32 = arith.constant 0 : i32
    %c0_i32_0 = arith.constant 0 : i32
    %c0_i32_1 = arith.constant 0 : i32
    return %c0_i32, %arg0, %c0_i32_0 : i32, i32, i32
  }
  func.func @transform_2(%arg0: i32) -> (i32, i32, i32) {
    %c0_i32 = arith.constant 0 : i32
    %c0_i32_0 = arith.constant 0 : i32
    %c0_i32_1 = arith.constant 0 : i32
    return %c0_i32, %arg0, %c0_i32_0 : i32, i32, i32
  }
}

</mosaic_0001>

<bundles_post_ra>
// kernel: linear_classifier_forward.1
= control target key start
LH: loop header
LB: loop body
LE: loop exit
PB: predicated region body
PF: predicated region fallthrough
CT: control target
= control target key end

     0   :  { %7 = vsyncpa [#allocation3], 0  ;;  %s125_s0 = inlined_call_operand.vmem [shape: f32[4], index: 0, kind: input, shape index: {}]   ;;  %s126_s1 = inlined_call_operand.vmem [shape: f32[3,8,128], index: 1, kind: input, shape index: {}]   ;;  %s127_s2 = inlined_call_operand.vmem [shape: f32[2,8,128], index: 2, kind: output, shape index: {}]  }
   0x1   :  { %s14_s11 = sshll.u32 %s125_s0, 4  ;;  %s15_s11 = int_to_ptr.vmem [resolvable:$true] %s14_s11 }
   0x2   :  { %s77_s12 = scalar_lea.vmem %s15_s11, 16  ;;  %p82_p1 = scmp.lt.s32.totalorder %s15_s11, %s15_s11 }
   0x3   :  { %p78_p0 = scmp.ne.s32.totalorder %s15_s11, %s77_s12  ;;  %p83_p2 = scmp.lt.s32.totalorder %s77_s12, %s77_s12 }
   0x5   :  { %p84_p3 = por %p83_p2, %p82_p1 }
   0x7   :  { %p85_p4 = pnand %p84_p3, %p78_p0 }
   0x9   :  { %88 = shalt.err (!%p85_p4)
}
   0xa   :  { %s91_s13 = smov [#allocation2]  }
   0xb   :  { %17 = dma.vmem_to_smem %s15_s11, 16, %s91_s13, [#allocation3]  }
   0xc   :  { %89 = dma.done.wait [#allocation3], 16  }
   0xd   :  { %90 = vsyncadd [#allocation3], 4294967280 }
   0xe   :  { %23 = sfence }
   0xf   :  { %s24_s14 = sld [smem:[#allocation2]]  ;;  %s62_s15 = sld [smem:[#allocation2 + $0x1]]  ;;  %v25_v0 = vld [vmem:[%s126_s1] sm:$0xff]  ;;  %v63_v1 = vld [vmem:[%s126_s1 + $0x8] sm:$0xff]  ;;  %v65_v2 = vld [vmem:[%s126_s1 + $0x10] sm:$0xff] }
  0x10   :  { %s64_s16 = sld [smem:[#allocation2 + $0x2]]  ;;  %s66_s17 = sld [smem:[#allocation2 + $0x3]] }
  0x15   :  { %v26_v3 = vstv %s24_s14  ;;  %v31_v4 = vstv %s62_s15 }
  0x16   :  { %v27_v5 = vmul.f32 %v26_v3, %v25_v0  ;;  %v32_v6 = vmul.f32 %v63_v1, %v31_v4  ;;  %v37_v7 = vstv %s64_s16  ;;  %v41_v10 = vstv %s66_s17 }
  0x17   :  { %v38_v8 = vmul.f32 %v65_v2, %v37_v7 }
  0x18   :  { %v33_v9 = vadd.f32 %v32_v6, %v27_v5 }
  0x1a   :  { %v39_v11 = vadd.f32 %v38_v8, %v33_v9 }
  0x1c   :  { %v42_v12 = vadd.f32 %v41_v10, %v39_v11 }
  0x1e   :  { %v49_v13 = vmul.f32 1.442695, %v42_v12  ;;  %v43_v14 = vsub.f32 0.0, %v42_v12 }
  0x20   :  { %69 = vpow2.f32 %v49_v13  ;;  %v44_v15 = vmul.f32 1.442695, %v43_v14 }
  0x22   :  { %71 = vpow2.f32 %v44_v15 }
  0x2a   :  { %v70_v16 = vpop.eup %69 }
  0x2b   :  { %v51_v17 = vadd.f32 1.0, %v70_v16 }
  0x2c   :  { %v72_v18 = vpop.eup %71 }
  0x2d   :  { %73 = vrcp.f32 %v51_v17  ;;  %v46_v19 = vadd.f32 1.0, %v72_v18 }
  0x2f   :  { %75 = vrcp.f32 %v46_v19 }
  0x37   :  { %v74_v20 = vpop.eup %73 }
  0x38   :  { %54 = vst [vmem:[%s127_s2] sm:$0xff] %v74_v20 }
  0x39   :  { %v76_v21 = vpop.eup %75 }
  0x3a   :  { %67 = vst [vmem:[%s127_s2 + $0x8] sm:$0xff] %v76_v21 }
  0x3b   :  { %61 = vsyncpa [#allocation3], 1 }

</bundles_post_ra>
